<compile_context>
chip_gen: v6e
topology: v6e:2x2x1
jax: 0.10.0
libtpu: 0.0.40
codegen_flags: <defaults>
</compile_context>

<pallas_src>
import jax
import jax.numpy as jnp
from jax.experimental import pallas as pl
from jax.experimental.pallas import tpu as pltpu


# ----------------------------- Pallas kernel ------------------------------- #

def _make_fused_kernel(HW, SPB):
    """Kernel for SPB samples folded along the lane axis (SPB*HW lanes)."""

    def kernel(x_ref, w_ref, sb_ref, o_ref):
        # x_ref : (1, K, SPB*HW)   im2col operand, K = 9*Cin, samples of this
        #                          group concatenated along the lane axis
        # w_ref : (Cout, K)        conv weights with BN(eval) scale folded in
        # sb_ref: (Cout, 2)        col 0 = conv-bias + BN shift, col 1 = selfmod bias
        # o_ref : (1, Cout, SPB*HW) lane-dense NC(HW) output
        acc = jnp.dot(w_ref[...], x_ref[0],
                      preferred_element_type=jnp.float32)      # (Cout, SPB*HW)
        shift = sb_ref[:, 0:1]                                  # (Cout, 1)
        bias = sb_ref[:, 1:2]                                   # (Cout, 1)
        y = acc + shift                                         # conv + BN(eval)

        # selfmod: per-(sample, channel) spatial mean; each sample occupies a
        # lane-tile-aligned HW-wide segment (HW is a multiple of 128).
        parts = []
        for s in range(SPB):                                    # static unroll
            seg = y[:, s * HW:(s + 1) * HW]                     # (Cout, HW)
            m = jnp.mean(seg, axis=1, keepdims=True)            # (Cout, 1)
            parts.append(jnp.abs(m) * seg)
        res = parts[0] if SPB == 1 else jnp.concatenate(parts, axis=1)
        o_ref[0] = res + bias                                   # one unmasked store

    return kernel


# ------------------------------ glue / wrapper ------------------------------ #

def _num_tensorcores():
    """2 for dual-TC v7x chips (batch split across cores), else 1 (fold batch)."""
    try:
        kind = jax.devices()[0].device_kind.lower()
    except Exception:
        return 1
    return 2 if ("v7" in kind or "7x" in kind) else 1


@jax.jit
def custom_conv2d_bn_forward(x_nchw, params):
    """Forward of CustomConv2dBN (abs=True, selfmod=True, BN in eval mode)."""
    eps = 1e-5
    conv_w = params["conv_w"].astype(jnp.float32)   # (Cout, Cin, 3, 3)
    conv_b = params["conv_b"].astype(jnp.float32)   # (Cout,)
    gamma = params["bn_gamma"].astype(jnp.float32)  # (Cout,)
    beta = params["bn_beta"].astype(jnp.float32)    # (Cout,)
    r_mean = params["bn_mean"].astype(jnp.float32)  # (Cout,)
    r_var = params["bn_var"].astype(jnp.float32)    # (Cout,)
    mod_bias = params["bias"].astype(jnp.float32)   # (Cout,)

    n, cin, h, w = x_nchw.shape
    cout = conv_w.shape[0]
    hw = h * w
    K = 9 * cin

    # Grid grouping: G grid steps, SPB samples folded per step (lane axis).
    ntc = _num_tensorcores()
    G = ntc if (n % ntc == 0) else 1
    spb = n // G

    # Fuse eval-mode BN into a per-channel affine; fold the scale into the
    # conv weights so the in-kernel epilogue is a single add.
    inv_std = 1.0 / jnp.sqrt(r_var + eps)
    bn_scale = gamma * inv_std                                   # (Cout,)
    shift = conv_b * bn_scale + beta - r_mean * bn_scale         # (Cout,)
    sb = jnp.stack([shift, mod_bias], axis=1)                    # (Cout, 2)

    # Folded weights as one (Cout, 9*Cin) slab; column index = cin*9 + kh*3 + kw.
    w_eff = (conv_w * bn_scale[:, None, None, None]).reshape(cout, K)

    # Wrapper-side im2col: 9 constant-offset slices of the zero-padded image,
    # stacked so the row index matches w_eff's column index.
    x32 = x_nchw.astype(jnp.float32)
    xp = jnp.pad(x32, ((0, 0), (0, 0), (1, 1), (1, 1)))          # (N, Cin, H+2, W+2)
    taps = [xp[:, :, kh:kh + h, kw:kw + w]
            for kh in range(3) for kw in range(3)]               # each (N, Cin, H, W)
    xcol = jnp.stack(taps, axis=2).reshape(n, K, hw)             # (N, K, HW)

    # Fold SPB samples of each group onto the lane axis: (G, K, SPB*HW).
    xg = (xcol.reshape(G, spb, K, hw)
              .transpose(0, 2, 1, 3)
              .reshape(G, K, spb * hw))

    kernel = _make_fused_kernel(hw, spb)

    out = pl.pallas_call(
        kernel,
        out_shape=jax.ShapeDtypeStruct((G, cout, spb * hw), jnp.float32),
        grid_spec=pltpu.PrefetchScalarGridSpec(
            num_scalar_prefetch=0,
            grid=(G,),
            in_specs=[
                pl.BlockSpec((1, K, spb * hw), lambda g: (g, 0, 0)),
                pl.BlockSpec((cout, K), lambda g: (0, 0)),
                pl.BlockSpec((cout, 2), lambda g: (0, 0)),
            ],
            out_specs=pl.BlockSpec((1, cout, spb * hw), lambda g: (g, 0, 0)),
        ),
        compiler_params=pltpu.CompilerParams(
            dimension_semantics=("parallel",)),
    )(xg, w_eff, sb)

    # Unfold the lane-axis batch packing back to NCHW.
    out = (out.reshape(G, cout, spb, hw)
              .transpose(0, 2, 1, 3)
              .reshape(n, cout, h, w))
    return out


# ------------------------------- reference --------------------------------- #

def _reference(x_nchw, params):
    eps = 1e-5
    x = jnp.transpose(x_nchw, (0, 2, 3, 1)).astype(jnp.float32)
    w = jnp.transpose(params["conv_w"], (2, 3, 1, 0))            # HWIO
    y = jax.lax.conv_general_dilated(
        x, w, window_strides=(1, 1), padding="SAME",
        dimension_numbers=("NHWC", "HWIO", "NHWC"))
    y = y + params["conv_b"]
    inv = 1.0 / jnp.sqrt(params["bn_var"] + eps)
    y = (y - params["bn_mean"]) * inv * params["bn_gamma"] + params["bn_beta"]
    s = jnp.mean(y, axis=(1, 2), keepdims=True)                  # (N,1,1,C)
    out = jnp.abs(s) * y + params["bias"]
    return jnp.transpose(out, (0, 3, 1, 2))


# --------------------------------- main ------------------------------------ #

if __name__ == "__main__":
    # Small shapes consistent with the module: nn.Conv2d(4, 8, 3, padding=1), BN(8).
    N, CIN, H, W = 2, 4, 16, 16
    COUT, KSZ = 8, 3

    key = jax.random.PRNGKey(0)
    ks = jax.random.split(key, 8)

    params = {
        "conv_w": jax.random.normal(ks[0], (COUT, CIN, KSZ, KSZ), jnp.float32) * 0.2,
        "conv_b": jax.random.normal(ks[1], (COUT,), jnp.float32) * 0.1,
        "bn_gamma": 1.0 + 0.1 * jax.random.normal(ks[2], (COUT,), jnp.float32),
        "bn_beta": 0.1 * jax.random.normal(ks[3], (COUT,), jnp.float32),
        "bn_mean": 0.1 * jax.random.normal(ks[4], (COUT,), jnp.float32),
        "bn_var": jnp.abs(jax.random.normal(ks[5], (COUT,), jnp.float32)) + 0.5,
        # module init is zeros; use nonzero values for a nontrivial test
        "bias": 0.1 * jax.random.normal(ks[6], (COUT,), jnp.float32),
    }

    x = jax.random.normal(ks[7], (N, CIN, H, W), jnp.float32)

    out = custom_conv2d_bn_forward(x, params)
    out = jax.block_until_ready(out)

    ref = _reference(x, params)
    assert out.shape == (N, COUT, H, W)
    assert jnp.allclose(out, ref, atol=1e-4, rtol=1e-4), "mismatch vs reference"

    print("KERNEL_OK")
</pallas_src>

<mosaic_0001>
module attributes {stable_mosaic.version = 11 : i64} {
  func.func @kernel(%arg0: i32, %arg1: memref<1x36x512xf32, #tpu.memory_space<vmem>>, %arg2: memref<8x36xf32, #tpu.memory_space<vmem>>, %arg3: memref<8x2xf32, #tpu.memory_space<vmem>>, %arg4: memref<1x8x512xf32, #tpu.memory_space<vmem>>) attributes {dimension_semantics = [#tpu.dimension_semantics<parallel>], iteration_bounds = array<i64: 1>, scalar_prefetch = 0 : i64, scratch_operands = 0 : i64, tpu.core_type = #tpu.core_type<tc>, window_params = [{transform_indices = @transform_0, window_bounds = array<i64: 1, 36, 512>}, {pipeline_mode = #tpu.pipeline_mode<synchronous>, transform_indices = @transform_1, window_bounds = array<i64: 8, 36>}, {pipeline_mode = #tpu.pipeline_mode<synchronous>, transform_indices = @transform_2, window_bounds = array<i64: 8, 2>}, {transform_indices = @transform_3, window_bounds = array<i64: 1, 8, 512>}]} {
    %c0 = arith.constant 0 : index
    %c0_0 = arith.constant 0 : index
    %0 = vector.load %arg2[%c0, %c0_0] : memref<8x36xf32, #tpu.memory_space<vmem>>, vector<8x36xf32>
    %c0_1 = arith.constant 0 : index
    %c0_2 = arith.constant 0 : index
    %c0_3 = arith.constant 0 : index
    %1 = vector.load %arg1[%c0_1, %c0_2, %c0_3] : memref<1x36x512xf32, #tpu.memory_space<vmem>>, vector<1x36x512xf32>
    %2 = vector.shape_cast %1 : vector<1x36x512xf32> to vector<36x512xf32>
    %cst = arith.constant dense<0.000000e+00> : vector<8x512xf32>
    %3 = tpu.matmul %0, %2, %cst {dimension_numbers = #tpu.dot_dimension_numbers<[1], [0], [0], [1], [0, 0, 1, 1], [], []>} : vector<8x36xf32>, vector<36x512xf32>, vector<8x512xf32> -> vector<8x512xf32>
    %c0_4 = arith.constant 0 : index
    %c0_5 = arith.constant 0 : index
    %4 = vector.load %arg3[%c0_4, %c0_5] : memref<8x2xf32, #tpu.memory_space<vmem>>, vector<8x1xf32>
    %c0_6 = arith.constant 0 : index
    %c1 = arith.constant 1 : index
    %5 = vector.load %arg3[%c0_6, %c1] : memref<8x2xf32, #tpu.memory_space<vmem>>, vector<8x1xf32>
    %6 = vector.broadcast %4 : vector<8x1xf32> to vector<8x512xf32>
    %7 = arith.addf %3, %6 : vector<8x512xf32>
    %8 = vector.extract_strided_slice %7 {offsets = [0, 0], sizes = [8, 256], strides = [1, 1]} : vector<8x512xf32> to vector<8x256xf32>
    %cst_7 = arith.constant dense<0.000000e+00> : vector<8xf32>
    %9 = vector.multi_reduction <add>, %8, %cst_7 [1] : vector<8x256xf32> to vector<8xf32>
    %10 = vector.shape_cast %9 : vector<8xf32> to vector<8x1xf32>
    %cst_8 = arith.constant 2.560000e+02 : f32
    %11 = vector.broadcast %cst_8 : f32 to vector<8x1xf32>
    %12 = arith.divf %10, %11 : vector<8x1xf32>
    %13 = math.absf %12 : vector<8x1xf32>
    %14 = vector.broadcast %13 : vector<8x1xf32> to vector<8x256xf32>
    %15 = arith.mulf %14, %8 : vector<8x256xf32>
    %16 = vector.extract_strided_slice %7 {offsets = [0, 256], sizes = [8, 256], strides = [1, 1]} : vector<8x512xf32> to vector<8x256xf32>
    %cst_9 = arith.constant dense<0.000000e+00> : vector<8xf32>
    %17 = vector.multi_reduction <add>, %16, %cst_9 [1] : vector<8x256xf32> to vector<8xf32>
    %18 = vector.shape_cast %17 : vector<8xf32> to vector<8x1xf32>
    %cst_10 = arith.constant 2.560000e+02 : f32
    %19 = vector.broadcast %cst_10 : f32 to vector<8x1xf32>
    %20 = arith.divf %18, %19 : vector<8x1xf32>
    %21 = math.absf %20 : vector<8x1xf32>
    %22 = vector.broadcast %21 : vector<8x1xf32> to vector<8x256xf32>
    %23 = arith.mulf %22, %16 : vector<8x256xf32>
    %24 = tpu.concatenate %15, %23 in 1 : vector<8x256xf32>, vector<8x256xf32> -> vector<8x512xf32>
    %25 = vector.broadcast %5 : vector<8x1xf32> to vector<8x512xf32>
    %26 = arith.addf %24, %25 : vector<8x512xf32>
    %c0_11 = arith.constant 0 : index
    %c0_12 = arith.constant 0 : index
    %c0_13 = arith.constant 0 : index
    %27 = vector.load %arg4[%c0_11, %c0_12, %c0_13] : memref<1x8x512xf32, #tpu.memory_space<vmem>>, vector<1x8x512xf32>
    %28 = vector.shape_cast %27 : vector<1x8x512xf32> to vector<8x512xf32>
    %29 = vector.shape_cast %26 : vector<8x512xf32> to vector<1x8x512xf32>
    tpu.vector_store %arg4[%c0_11, %c0_12, %c0_13], %29 {strides = array<i32>} : memref<1x8x512xf32, #tpu.memory_space<vmem>>, vector<1x8x512xf32>,
    return
  }
  func.func @transform_0(%arg0: i32) -> (i32, i32, i32) {
    %c0_i32 = arith.constant 0 : i32
    %c0_i32_0 = arith.constant 0 : i32
    %c0_i32_1 = arith.constant 0 : i32
    return %arg0, %c0_i32, %c0_i32_0 : i32, i32, i32
  }
  func.func @transform_1(%arg0: i32) -> (i32, i32) {
    %c0_i32 = arith.constant 0 : i32
    %c0_i32_0 = arith.constant 0 : i32
    %c0_i32_1 = arith.constant 0 : i32
    return %c0_i32, %c0_i32_0 : i32, i32
  }
  func.func @transform_2(%arg0: i32) -> (i32, i32) {
    %c0_i32 = arith.constant 0 : i32
    %c0_i32_0 = arith.constant 0 : i32
    %c0_i32_1 = arith.constant 0 : i32
    return %c0_i32, %c0_i32_0 : i32, i32
  }
  func.func @transform_3(%arg0: i32) -> (i32, i32, i32) {
    %c0_i32 = arith.constant 0 : i32
    %c0_i32_0 = arith.constant 0 : i32
    %c0_i32_1 = arith.constant 0 : i32
    return %arg0, %c0_i32, %c0_i32_0 : i32, i32, i32
  }
}

</mosaic_0001>

<bundles_post_ra>
// kernel: custom_conv2d_bn_forward.1
= control target key start
LH: loop header
LB: loop body
LE: loop exit
PB: predicated region body
PF: predicated region fallthrough
CT: control target
= control target key end

     0   :  { %vm45_vm0 = vcmask 1043456   ;;  %v243_v3 = vmov 0.0   ;;  %vm41_vm1 = vcmask 293888   ;;  %v244_v23 = vmov 0   ;;  %s344_s0 = inlined_call_operand.vmem [shape: f32[1,36,512], index: 0, kind: input, shape index: {}]   ;;  %s345_s1 = inlined_call_operand.vmem [shape: f32[8,36], index: 1, kind: input, shape index: {}]   ;;  %s346_s2 = inlined_call_operand.vmem [shape: f32[8,2], index: 2, kind: input, shape index: {}]   ;;  %s347_s3 = inlined_call_operand.vmem [shape: f32[1,8,512], index: 3, kind: output, shape index: {}]  }
   0x1   :  { %v32_v0 = vld [vmem:[%s344_s0 + $0x88] sm:$0xf]  ;;  %v34_v1 = vld [vmem:[%s344_s0 + $0x98] sm:$0xf]  ;;  %v31_v2 = vld [vmem:[%s344_s0 + $0x80] sm:$0xf]  ;;  %122 = vmatprep.mubr.f32.mxu0 %v243_v3  ;;  %193 = vmatprep.mubr.f32.mxu1 %v243_v3 }
   0x2   :  { %231 = vmatprep.subr.msk.mxu0 %vm45_vm0, %v32_v0  ;;  %234 = vmatprep.subr.msk.mxu1 %vm45_vm0, %v34_v1  ;;  %v33_v4 = vld [vmem:[%s344_s0 + $0x90] sm:$0xf]  ;;  %v28_v5 = vld [vmem:[%s344_s0 + $0x68] sm:$0xff]  ;;  %v30_v6 = vld [vmem:[%s344_s0 + $0x78] sm:$0xff]  ;;  %v245_v24 = vmov 1  }
   0x3   :  { %232 = vmatpush1.msk.msra.mxu0 %vm45_vm0, %v31_v2  ;;  %235 = vmatpush1.msk.msra.mxu1 %vm45_vm0, %v33_v4  ;;  %v27_v7 = vld [vmem:[%s344_s0 + $0x60] sm:$0xff]  ;;  %v29_v8 = vld [vmem:[%s344_s0 + $0x70] sm:$0xff]  ;;  %v24_v9 = vld [vmem:[%s344_s0 + $0x48] sm:$0xff] }
   0x4   :  { %82 = vmatprep.subr.mxu0 %v28_v5  ;;  %153 = vmatprep.subr.mxu1 %v30_v6  ;;  %v26_v10 = vld [vmem:[%s344_s0 + $0x58] sm:$0xff]  ;;  %v23_v11 = vld [vmem:[%s344_s0 + $0x40] sm:$0xff]  ;;  %v25_v12 = vld [vmem:[%s344_s0 + $0x50] sm:$0xff] }
   0x5   :  { %83 = vmatpush1.msra.mxu0 %v27_v7  ;;  %154 = vmatpush1.msra.mxu1 %v29_v8  ;;  %v20_v13 = vld [vmem:[%s344_s0 + $0x28] sm:$0xff]  ;;  %v22_v14 = vld [vmem:[%s344_s0 + $0x38] sm:$0xff]  ;;  %v19_v15 = vld [vmem:[%s344_s0 + $0x20] sm:$0xff] }
   0x6   :  { %84 = vmatprep.subr.mxu0 %v24_v9  ;;  %155 = vmatprep.subr.mxu1 %v26_v10  ;;  %v21_v16 = vld [vmem:[%s344_s0 + $0x30] sm:$0xff]  ;;  %v16_v17 = vld [vmem:[%s344_s0 + $0x8] sm:$0xff]  ;;  %v18_v18 = vld [vmem:[%s344_s0 + $0x18] sm:$0xff] }
   0x7   :  { %85 = vmatpush1.msra.mxu0 %v23_v11  ;;  %156 = vmatpush1.msra.mxu1 %v25_v12  ;;  %v15_v19 = vld [vmem:[%s344_s0] sm:$0xff]  ;;  %v17_v20 = vld [vmem:[%s344_s0 + $0x10] sm:$0xff] }
   0x8   :  { %86 = vmatprep.subr.mxu0 %v20_v13  ;;  %157 = vmatprep.subr.mxu1 %v22_v14  ;;  %v14_v21 = vld [vmem:[%s345_s1] sm:$0xff] }
   0x9   :  { %87 = vmatpush1.msra.mxu0 %v19_v15  ;;  %158 = vmatpush1.msra.mxu1 %v21_v16  ;;  %v35_v22 = vld [vmem:[%s346_s2] sm:$0xff] }
   0xa   :  { %88 = vmatprep.subr.mxu0 %v16_v17  ;;  %159 = vmatprep.subr.mxu1 %v18_v18 }
   0xb   :  { %89 = vmatpush1.msra.mxu0 %v15_v19  ;;  %160 = vmatpush1.msra.mxu1 %v17_v20 }
   0xc   :  { %233 = vmatmul.mubr.msk.f32.vlgmr.msra.gmra.mxu0 %vm41_vm1, %v14_v21  ;;  %236 = vmatmul.mubr.msk.f32.vlgmr.msra.gmra.mxu1 %vm41_vm1, %v14_v21 }
   0xd   :  { %240 = vset.pattern.permute.xlu0 %v244_v23  ;;  %241 = vset.pattern.permute.xlu1 %v245_v24 }
   0xe   :  { %38 = vperm.xlu0 %240, %v35_v22  }
  0x12   :  { %242 = vset.pattern.permute.xlu0 %v245_v24 }
  0x89   :  { %v39_v25 = vpop.permute.xlu0 %38 }
  0xcc   :  { %v124_v26 = vpop.f32.mrf.mxu0  ;;  %v195_v27 = vpop.f32.mrf.mxu1 }
  0xcd   :  { %v125_v30 = vadd.f32 %v124_v26, %v39_v25  ;;  %v196_v31 = vadd.f32 %v195_v27, %v39_v25 }
  0xce   :  { %v126_v28 = vpop.f32.mrf.mxu0  ;;  %v197_v29 = vpop.f32.mrf.mxu1 }
  0xcf   :  { %v127_v32 = vadd.f32 %v126_v28, %v39_v25  ;;  %v198_v33 = vadd.f32 %v197_v29, %v39_v25 }
  0xd1   :  { %v208_v34 = vadd.f32 %v198_v33, %v196_v31  ;;  %v200_v35 = vadd.f32 %v127_v32, %v125_v30 }
  0xd3   :  { %209 = vadd.xlane.f32.xlu1 %v208_v34  ;;  %201 = vadd.xlane.f32.xlu0 %v200_v35 }
  0xe4   :  { %216 = vperm.xlu1 %241, %v35_v22  }
 0x15c   :  { %v210_v36 = vpop.xlane.xlu1 %209  ;;  %v202_v37 = vpop.xlane.xlu0 %201 }
 0x15d   :  { %v211_v38 = vmul.f32 0.00390625, %v210_v36  ;;  %v204_v39 = vmul.f32 0.00390625, %v202_v37 }
 0x15f   :  { %v212_v40 = vand.u32 2147483647, %v211_v38  ;;  %v205_v41 = vand.u32 2147483647, %v204_v39 }
 0x160   :  { %v217_v42 = vpop.permute.xlu1 %216 }
 0x161   :  { %v213_v43 = vmul.f32 %v212_v40, %v196_v31  ;;  %v214_v44 = vmul.f32 %v212_v40, %v198_v33  ;;  %v206_v45 = vmul.f32 %v205_v41, %v125_v30  ;;  %v207_v46 = vmul.f32 %v205_v41, %v127_v32 }
 0x163   :  { %v219_v47 = vadd.f32 %v217_v42, %v206_v45  ;;  %v220_v48 = vadd.f32 %v217_v42, %v207_v46  ;;  %v221_v49 = vadd.f32 %v217_v42, %v213_v43  ;;  %v222_v50 = vadd.f32 %v217_v42, %v214_v44 }
 0x165   :  { %223 = vst [vmem:[%s347_s3] sm:$0xff] %v219_v47  ;;  %224 = vst [vmem:[%s347_s3 + $0x8] sm:$0xff] %v220_v48 }
 0x166   :  { %225 = vst [vmem:[%s347_s3 + $0x10] sm:$0xff] %v221_v49  ;;  %226 = vst [vmem:[%s347_s3 + $0x18] sm:$0xff] %v222_v50 }

</bundles_post_ra>
